<compile_context>
chip_gen: v7x
topology: tpu7x:2x2x1
jax: 0.10.0
libtpu: 0.0.40
codegen_flags: <defaults>
</compile_context>

<pallas_src>
import functools
import math

import jax
import jax.numpy as jnp
from jax.experimental import pallas as pl
from jax.experimental.pallas import tpu as pltpu


def _round_up(a: int, m: int) -> int:
    return ((a + m - 1) // m) * m


def make_pe_table(nd: int, max_len: int = 1000, dtype=jnp.float32) -> jnp.ndarray:
    """Deterministic positional-encoding buffer, shape [max_len, 1, nd].

    Mirrors the PyTorch __init__:
        pe[:, 0::2] = sin(position * div_term)
        pe[:, 1::2] = cos(position * div_term)
        pe = pe.unsqueeze(0).transpose(0, 1)   # -> [max_len, 1, nd]
    (Also handles odd nd, which the PyTorch original silently breaks on.)
    """
    position = jnp.arange(0, max_len, dtype=jnp.float32)[:, None]          # [L, 1]
    div_term = jnp.exp(
        jnp.arange(0, nd, 2, dtype=jnp.float32) * (-math.log(10000.0) / nd)
    )                                                                       # [ceil(nd/2)]
    angles = position * div_term                                            # [L, ceil(nd/2)]
    pe = jnp.zeros((max_len, nd), dtype=jnp.float32)
    pe = pe.at[:, 0::2].set(jnp.sin(angles))
    pe = pe.at[:, 1::2].set(jnp.cos(angles[:, : nd // 2]))                  # odd-nd safe
    return pe[:, None, :].astype(dtype)                                     # [L, 1, nd]


def _pe_add_kernel(x_ref, pe_ref, o_ref, *, batch: int):
    # x_ref / o_ref: (tt, b*d) lane-dense tiles; pe_ref: (tt, d).
    # Flattened row layout is [x[t,0,:], x[t,1,:], ...], so pe broadcasts over
    # batch by tiling b times along the lane axis.
    pe = pe_ref[...]
    if batch > 1:
        pe = jnp.tile(pe, (1, batch))
    o_ref[...] = x_ref[...] + pe


def _plan_tiling(t: int, b: int, d: int, itemsize: int, *,
                 time_block: int | None = None,
                 target_tile_bytes: int = 4 * 1024 * 1024,
                 min_steps: int = 4,
                 budget_bytes: int = 48 * 1024 * 1024) -> tuple[int, int]:
    """Pick the time block and a VMEM limit from *padded* (sublane, lane) tile bytes."""
    lane_w = b * d
    sub = max(8, 32 // itemsize)                 # sublane pack: 8 f32 / 16 bf16 / 32 int8
    x_row_bytes = _round_up(lane_w, 128) * itemsize
    pe_row_bytes = _round_up(d, 128) * itemsize

    if time_block is None:
        tt = max(sub, (target_tile_bytes // x_row_bytes) // sub * sub)
        # Keep >= min_steps grid steps when t allows: lets v7x's two TensorCores
        # both pull HBM bandwidth and overlaps DMA-in(i+1) with writeback(i-1).
        tt = min(tt, max(sub, _round_up(-(-t // min_steps), sub)))
    else:
        tt = max(1, int(time_block))
        if tt < t:
            tt = _round_up(tt, 8)                # (8,128) constraint on 2nd-to-last dim

    def footprint(rows: int) -> int:
        rows = _round_up(rows, sub)
        # 2 x-in (double-buffered) + 2 out + 2 pe-in + 1 pe lane-broadcast temp
        # + headroom for Mosaic internal scratch.
        return 5 * rows * x_row_bytes + 2 * rows * pe_row_bytes + (2 << 20)

    # Shrink the tile if the padded footprint would exceed the budget
    # (keeps the same code safe on v7x's 64 MiB physical VMEM).
    while footprint(min(tt, t)) > budget_bytes and tt > sub:
        tt = max(sub, ((tt // 2) // sub) * sub)

    tt = min(tt, t)
    vmem_limit = int(min(max(footprint(tt), 32 << 20), 60 << 20))
    return int(tt), vmem_limit


def positional_encoding_forward(x: jnp.ndarray, pe: jnp.ndarray,
                                *, time_block: int | None = None) -> jnp.ndarray:
    """x: [t, b, d], pe: [max_len, 1, d] (or [max_len, d])  ->  [t, b, d]  (x + pe[:t])"""
    t, b, d = x.shape

    if pe.ndim == 3:
        if pe.shape[1] != 1 or pe.shape[2] != d:
            raise ValueError(f"pe must have shape [max_len, 1, {d}], got {pe.shape}")
        pe2 = pe.reshape(pe.shape[0], d)
    elif pe.ndim == 2 and pe.shape[1] == d:
        pe2 = pe
    else:
        raise ValueError(f"pe must have shape [max_len, 1, {d}] or [max_len, {d}], got {pe.shape}")

    max_len = pe2.shape[0]
    if t > max_len:
        raise ValueError(f"sequence length t={t} exceeds pe max_len={max_len}")

    # Match dtypes so pe HBM traffic is x_traffic / b even for bf16 activations.
    # (Slight divergence from PyTorch promotion when x is lower precision than
    # pe: we round pe first and add in x.dtype; negligible for sin/cos tables.)
    pe2 = pe2.astype(x.dtype)

    itemsize = jnp.dtype(x.dtype).itemsize
    tt, vmem_limit = _plan_tiling(t, b, d, itemsize, time_block=time_block)

    # Lane/sublane-dense view of x / out: [t, b, d] -> [t, b*d] (no copy).
    x2 = x.reshape(t, b * d)

    out2 = pl.pallas_call(
        functools.partial(_pe_add_kernel, batch=b),
        out_shape=jax.ShapeDtypeStruct((t, b * d), x.dtype),
        grid_spec=pltpu.PrefetchScalarGridSpec(
            num_scalar_prefetch=0,
            grid=(pl.cdiv(t, tt),),
            in_specs=[
                pl.BlockSpec((tt, b * d), lambda i: (i, 0)),
                # Full pe table passed in; the index_map selects the matching
                # time rows, so no host-side pe[:t] slice is materialized.
                pl.BlockSpec((tt, d), lambda i: (i, 0)),
            ],
            out_specs=pl.BlockSpec((tt, b * d), lambda i: (i, 0)),
        ),
        compiler_params=pltpu.CompilerParams(
            dimension_semantics=("parallel",),
            vmem_limit_bytes=vmem_limit,
        ),
    )(x2, pe2)

    return out2.reshape(t, b, d)


if __name__ == "__main__":
    key = jax.random.PRNGKey(0)

    # --- Small shapes consistent with forward: x is [t, b, d] ----------------
    t, b, d = 8, 2, 32
    max_len = 64

    x = jax.random.normal(key, (t, b, d), dtype=jnp.float32)
    pe = make_pe_table(nd=d, max_len=max_len, dtype=jnp.float32)

    out = jax.block_until_ready(positional_encoding_forward(x, pe))
    ref = x + pe[:t]
    assert out.shape == (t, b, d)
    assert jnp.allclose(out, ref, atol=1e-6, rtol=1e-6)

    # --- Multi-step grid with a partial trailing time block ------------------
    t2 = 40
    x2 = jax.random.normal(jax.random.PRNGKey(1), (t2, b, d), dtype=jnp.float32)
    out2 = jax.block_until_ready(positional_encoding_forward(x2, pe, time_block=16))
    ref2 = x2 + pe[:t2]
    assert jnp.allclose(out2, ref2, atol=1e-6, rtol=1e-6)

    # --- (8,128)-aligned, lane/sublane-dense shape with bf16 activations -----
    t3, b3, d3 = 64, 4, 128
    pe3 = make_pe_table(nd=d3, max_len=128, dtype=jnp.float32)
    x3 = jax.random.normal(jax.random.PRNGKey(2), (t3, b3, d3), dtype=jnp.bfloat16)
    out3 = jax.block_until_ready(positional_encoding_forward(x3, pe3))
    ref3 = x3 + pe3[:t3].astype(jnp.bfloat16)                  # same cast-then-add order
    assert out3.dtype == jnp.bfloat16
    assert jnp.allclose(out3.astype(jnp.float32), ref3.astype(jnp.float32),
                        atol=2e-2, rtol=2e-2)

    print("KERNEL_OK")
</pallas_src>

<mosaic_0001>
module attributes {stable_mosaic.version = 11 : i64} {
  func.func @_pe_add_kernel(%arg0: i32, %arg1: memref<8x64xf32, #tpu.memory_space<vmem>>, %arg2: memref<8x32xf32, #tpu.memory_space<vmem>>, %arg3: memref<8x64xf32, #tpu.memory_space<vmem>>) attributes {dimension_semantics = [#tpu.dimension_semantics<parallel>], iteration_bounds = array<i64: 1>, scalar_prefetch = 0 : i64, scratch_operands = 0 : i64, tpu.core_type = #tpu.core_type<tc>, window_params = [{transform_indices = @transform_0, window_bounds = array<i64: 8, 64>}, {transform_indices = @transform_1, window_bounds = array<i64: 8, 32>}, {transform_indices = @transform_2, window_bounds = array<i64: 8, 64>}]} {
    %c0 = arith.constant 0 : index
    %c0_0 = arith.constant 0 : index
    %0 = vector.load %arg2[%c0, %c0_0] : memref<8x32xf32, #tpu.memory_space<vmem>>, vector<8x32xf32>
    %1 = tpu.concatenate %0, %0 in 1 : vector<8x32xf32>, vector<8x32xf32> -> vector<8x64xf32>
    %c0_1 = arith.constant 0 : index
    %c0_2 = arith.constant 0 : index
    %2 = vector.load %arg1[%c0_1, %c0_2] : memref<8x64xf32, #tpu.memory_space<vmem>>, vector<8x64xf32>
    %3 = arith.addf %2, %1 : vector<8x64xf32>
    %c0_3 = arith.constant 0 : index
    %c0_4 = arith.constant 0 : index
    %4 = vector.load %arg3[%c0_3, %c0_4] : memref<8x64xf32, #tpu.memory_space<vmem>>, vector<8x64xf32>
    tpu.vector_store %arg3[%c0_3, %c0_4], %3 {strides = array<i32>} : memref<8x64xf32, #tpu.memory_space<vmem>>, vector<8x64xf32>,
    return
  }
  func.func @transform_0(%arg0: i32) -> (i32, i32) {
    %c0_i32 = arith.constant 0 : i32
    %c0_i32_0 = arith.constant 0 : i32
    return %arg0, %c0_i32 : i32, i32
  }
  func.func @transform_1(%arg0: i32) -> (i32, i32) {
    %c0_i32 = arith.constant 0 : i32
    %c0_i32_0 = arith.constant 0 : i32
    return %arg0, %c0_i32 : i32, i32
  }
  func.func @transform_2(%arg0: i32) -> (i32, i32) {
    %c0_i32 = arith.constant 0 : i32
    %c0_i32_0 = arith.constant 0 : i32
    return %arg0, %c0_i32 : i32, i32
  }
}

</mosaic_0001>

<bundles_post_ra>
// kernel: tpu_custom_call.1
= control target key start
LH: loop header
LB: loop body
LE: loop exit
PB: predicated region body
PF: predicated region fallthrough
CT: control target
= control target key end

     0   :  { %s98_s0 = inlined_call_operand.vmem [shape: f32[8,64], index: 0, kind: input, shape index: {}]   ;;  %s99_s1 = inlined_call_operand.vmem [shape: f32[64,32], index: 1, kind: input, shape index: {}]   ;;  %s100_s2 = inlined_call_operand.hbm [shape: f32[8,64], index: 2, kind: output, shape index: {}]  }
   0x1   :  { %v12_v0 = vld [vmem:[%s99_s1] sm:$0xff] }
   0x2   :  { %7 = vsyncpa [#allocation3], 0  ;;  %s63_s11 = smov 32   ;;  %vm17_vm0 = vcmask 261120   ;;  %v19_v1 = vld [vmem:[%s98_s0] sm:$0xff]  ;;  %s64_s14 = smov [#allocation2]  }
   0x3   :  { %14 = vrot.lane.b32.xlu0 %v12_v0, %s63_s11  ;;  %s29_s15 = sshll.u32 %s64_s14, 4  ;;  %vm21_vm1 = vcmask 523264   ;;  %s30_s15 = int_to_ptr.vmem [resolvable:$true] %s29_s15 }
   0x4   :  { %s39_s16 = scalar_lea.vmem %s30_s15, 128  ;;  %p44_p1 = scmp.lt.s32.totalorder %s30_s15, %s30_s15 }
   0x5   :  { %p40_p0 = scmp.ne.s32.totalorder %s30_s15, %s39_s16  ;;  %p45_p2 = scmp.lt.s32.totalorder %s39_s16, %s39_s16 }
   0x7   :  { %p46_p3 = por %p45_p2, %p44_p1 }
   0x9   :  { %p47_p4 = pnand %p46_p3, %p40_p0 }
  0x75   :  { %v15_v2 = vpop.permute.xlu0 %14 }
  0x76   :  { %v18_v3 = vsel %vm17_vm0, %v12_v0, %v15_v2 }
  0x77   :  { %v20_v4 = vadd.f32 %v19_v1, %v18_v3 }
  0x79   :  { %22 = vst.msk [vmem:[#allocation2] sm:$0xff] %vm21_vm1, %v20_v4 }
  0x7a   :  { %50 = shalt.err (!%p47_p4)
}
  0x7b   :  { %s51_s18 = scalar_lea.hbm %s100_s2, 128 }
  0x7c   :  { %p52_p5 = scmp.ne.s32.totalorder %s100_s2, %s51_s18  ;;  %p55_p6 = scmp.lt.u32.totalorder %s51_s18, %s100_s2 }
  0x7e   :  { %p57_p7 = pnand %p55_p6, %p52_p5 }
  0x80   :  { %60 = shalt.err (!%p57_p7)
}
  0x81   :  { %32 = dma.vmem_to_hbm [thread:$0]  %s30_s15, 128, %s100_s2, [#allocation3]  }
  0x82   :  { %61 = dma.done.wait [#allocation3], 128  }
  0x83   :  { %62 = vsyncadd [#allocation3], 4294967168 }
  0x84   :  { %36 = vsyncpa [#allocation3], 1 }

</bundles_post_ra>
